<compile_context>
chip_gen: v6e
topology: v6e:2x2x1
jax: 0.10.0
libtpu: 0.0.40
codegen_flags: <defaults>
</compile_context>

<pallas_src>
import functools

import jax
import jax.numpy as jnp
from jax import lax
from jax.experimental import pallas as pl
from jax.experimental.pallas import tpu as pltpu

_LANES = 128  # padded class dimension (one full lane group)


def _round_up(n, m):
    return ((n + m - 1) // m) * m


def _pick_tile(batch):
    """Rows per grid step: a multiple of 8 sublanes, >= 2 grid steps whenever
    possible (v7x megacore sharding), and <= 256 rows so padding waste on the
    final partial tile stays bounded."""
    if batch <= 8:
        return batch  # single tile; block dim == full array dim is always legal
    return min(256, _round_up((batch + 1) // 2, 8))


def _resident_spec(shape):
    """BlockSpec for a grid-invariant operand (constant index map).

    Single-buffered when the running JAX supports pipeline_mode — the operand
    is never re-fetched, so a second pipeline buffer is pure VMEM waste."""
    index_map = lambda i: (0,) * len(shape)
    try:
        return pl.BlockSpec(shape, index_map,
                            pipeline_mode=pl.Buffered(buffer_count=1))
    except (TypeError, AttributeError, ValueError):
        # Older JAX without pipeline_mode: fall back to default double buffer.
        return pl.BlockSpec(shape, index_map)


def _head_kernel(x_ref, w1_ref, b1_ref, w2_ref, b2_ref, lab_ref,
                 logits_ref, loss_ref, *, num_classes, batch):
    """One batch tile of the classifier head + per-tile CE partial sum.

    x_ref:      (TB, H)   f32    CLS rows (cast to bf16 in-kernel)
    w1_ref:     (H, H)    bf16   resident, single-buffered
    b1_ref:     (1, H)    f32
    w2_ref:     (H, CP)   bf16   classes padded to CP=128 lanes
    b2_ref:     (1, CP)   f32
    lab_ref:    (TB, 1)   int32
    logits_ref: (TB, CP)  f32    (wrapper slices [:, :num_classes])
    loss_ref:   (1, 8, 128) f32  per-tile sum of per-example CE, broadcast
    """
    tile = pl.program_id(0)
    tb = x_ref.shape[0]
    cp = logits_ref.shape[1]

    # Linear(H, H) + Tanh: bf16 operands, f32 accumulation on the MXU.
    # The f32 -> bf16 cast of the CLS rows happens here (no wrapper copy).
    x = x_ref[...].astype(jnp.bfloat16)
    h = jnp.dot(x, w1_ref[...], preferred_element_type=jnp.float32)
    h = jnp.tanh(h + b1_ref[...])

    # Linear(H, 2) padded to 128 output lanes (lane-dense matmul + store).
    logits = jnp.dot(h.astype(jnp.bfloat16), w2_ref[...],
                     preferred_element_type=jnp.float32) + b2_ref[...]
    logits_ref[...] = logits

    # Column / row validity masks (padded classes; partial last batch tile —
    # out-of-range rows hold unspecified data and are masked out here).
    col_ids = lax.broadcasted_iota(jnp.int32, (tb, cp), 1)
    valid_col = col_ids < num_classes
    row_ids = lax.broadcasted_iota(jnp.int32, (tb, 1), 0) + tile * tb
    valid_row = row_ids < batch

    # Numerically stable log-sum-exp over the real classes only (f32 logits,
    # so the -1e30 mask value is safe).
    neg_big = jnp.float32(-1e30)
    masked = jnp.where(valid_col, logits, neg_big)
    m = jnp.max(masked, axis=-1, keepdims=True)                     # (TB, 1)
    e = jnp.where(valid_col, jnp.exp(masked - m), 0.0)
    lse = m + jnp.log(jnp.sum(e, axis=-1, keepdims=True))           # (TB, 1)

    # Pick logit of the target class via iota == label (no one-hot stream).
    pick = jnp.where(col_ids == lab_ref[...], logits, 0.0)
    picked = jnp.sum(pick, axis=-1, keepdims=True)                  # (TB, 1)

    per_example = jnp.where(valid_row, lse - picked, 0.0)           # (TB, 1)
    part = jnp.sum(per_example)                                     # scalar
    loss_ref[...] = jnp.full(loss_ref.shape, part, dtype=jnp.float32)


def prepare_head_params(w1, b1, w2, b2):
    """One-time weight preparation, hoisted out of the per-call forward so the
    f32->bf16 cast of W1 and the lane padding of W2/b2 are not re-done (and
    re-read from HBM) on every step."""
    H, C = w2.shape
    assert w1.shape == (H, H) and b1.shape == (H,) and b2.shape == (C,)
    assert C <= _LANES
    w1_b = w1.astype(jnp.bfloat16)
    b1_r = b1.reshape(1, H).astype(jnp.float32)
    w2_p = jnp.zeros((H, _LANES), jnp.bfloat16).at[:, :C].set(
        w2.astype(jnp.bfloat16))
    b2_p = jnp.zeros((1, _LANES), jnp.float32).at[0, :C].set(
        b2.astype(jnp.float32))
    return (w1_b, b1_r, w2_p, b2_p)


def classification_head(last_hidden_state, labels, params, *, num_classes=2):
    """Pallas-backed equivalent of ClassificationModel's head + loss.

    last_hidden_state: [B, S, H] float32   (backbone output)
    labels:            [B]       int32
    params:            output of prepare_head_params (bf16/padded weights)
    Returns (loss: scalar float32, logits: [B, num_classes] float32).
    """
    w1_b, b1_r, w2_p, b2_p = params
    B, S, H = last_hidden_state.shape
    CP = _LANES
    assert w1_b.shape == (H, H)

    # CLS pooling without materializing a sliced/cast/padded copy of x: view
    # the activations as (B, S*H) and let the BlockSpec pull only columns
    # [0, H) (the CLS token) of every row.  Requires H % 128 == 0 for a
    # lane-legal block; otherwise fall back to an XLA slice (no pad copies).
    if H % 128 == 0:
        x_in = last_hidden_state.reshape(B, S * H)
    else:
        x_in = last_hidden_state[:, 0, :]

    labels2d = labels.reshape(B, 1).astype(jnp.int32)

    TB = _pick_tile(B)
    G = pl.cdiv(B, TB)

    kernel = functools.partial(_head_kernel, num_classes=num_classes, batch=B)

    # VMEM budget: single-buffered weights + double-buffered streamed tiles,
    # with 2x headroom.  Never below the common 32 MiB default (no regression
    # on small shapes); grows with H so v5e's 16 MiB scoped default does not
    # cause a compile-time OOM at larger hidden sizes.
    est = (H * H * 2 + H * CP * 2 + (H + CP) * 4                     # weights
           + 2 * (TB * H * 4 + TB * 4 + TB * CP * 4 + 8 * 128 * 4)   # streams
           + TB * H * 4 + TB * CP * 4)                               # temps
    vmem_limit = int(min(100 * 1024 * 1024, max(32 * 1024 * 1024, 2 * est)))

    cost = pl.CostEstimate(
        flops=2 * G * TB * H * (H + CP),
        transcendentals=G * TB * (H + CP),
        bytes_accessed=(G * TB * H * 4 + H * H * 2 + H * CP * 2 + (H + CP) * 4
                        + B * 4 + B * CP * 4 + G * 8 * 128 * 4),
    )

    logits_p, loss_parts = pl.pallas_call(
        kernel,
        out_shape=(
            jax.ShapeDtypeStruct((B, CP), jnp.float32),
            jax.ShapeDtypeStruct((G, 8, 128), jnp.float32),
        ),
        grid=(G,),
        in_specs=[
            pl.BlockSpec((TB, H), lambda i: (i, 0)),   # CLS rows (strided DMA)
            _resident_spec((H, H)),                    # W1 (fetched once)
            _resident_spec((1, H)),                    # b1
            _resident_spec((H, CP)),                   # W2 (lane-padded)
            _resident_spec((1, CP)),                   # b2 (lane-padded)
            pl.BlockSpec((TB, 1), lambda i: (i, 0)),   # labels (per-tile)
        ],
        out_specs=(
            pl.BlockSpec((TB, CP), lambda i: (i, 0)),        # logits
            pl.BlockSpec((1, 8, 128), lambda i: (i, 0, 0)),  # loss partials
        ),
        compiler_params=pltpu.CompilerParams(
            dimension_semantics=("parallel",),
            vmem_limit_bytes=vmem_limit),
        cost_estimate=cost,
    )(x_in, w1_b, b1_r, w2_p, b2_p, labels2d)

    logits = logits_p[:, :num_classes]
    loss = jnp.sum(loss_parts[:, 0, 0]) / jnp.float32(B)
    return loss, logits


def _reference(last_hidden_state, labels, w1, b1, w2, b2):
    x = last_hidden_state[:, 0, :]
    h = jnp.tanh(x @ w1 + b1)
    logits = h @ w2 + b2
    logp = jax.nn.log_softmax(logits, axis=-1)
    loss = -jnp.mean(jnp.take_along_axis(logp, labels[:, None], axis=-1))
    return loss, logits


if __name__ == "__main__":
    # Small shapes consistent with the forward pass (H multiple of 128 so the
    # direct (B, S*H)-view CLS path is exercised).
    B, S, H, C = 2, 8, 128, 2

    key = jax.random.PRNGKey(0)
    k_hs, k_w1, k_b1, k_w2, k_b2, k_lab = jax.random.split(key, 6)

    # Synthetic backbone output (stands in for text_model(...).last_hidden_state).
    last_hidden_state = jax.random.normal(k_hs, (B, S, H), dtype=jnp.float32)
    labels = jax.random.randint(k_lab, (B,), 0, C, dtype=jnp.int32)

    # Deterministic parameter init (nn.Linear-like uniform(-1/sqrt(fan_in), ...)).
    bound1 = 1.0 / jnp.sqrt(jnp.float32(H))
    w1 = jax.random.uniform(k_w1, (H, H), jnp.float32, -bound1, bound1)
    b1 = jax.random.uniform(k_b1, (H,), jnp.float32, -bound1, bound1)
    w2 = jax.random.uniform(k_w2, (H, C), jnp.float32, -bound1, bound1)
    b2 = jax.random.uniform(k_b2, (C,), jnp.float32, -bound1, bound1)

    # TODO(synk): the transformer backbone (self.text_model) is an external HF
    # model and is not reimplemented here; the kernel covers the classifier + loss.

    # One-time weight prep (cast/pad) kept out of the jitted per-step forward.
    params = prepare_head_params(w1, b1, w2, b2)

    fwd = jax.jit(functools.partial(classification_head, num_classes=C))
    loss, logits = fwd(last_hidden_state, labels, params)
    jax.block_until_ready((loss, logits))

    ref_loss, ref_logits = _reference(last_hidden_state, labels, w1, b1, w2, b2)
    # bf16 matmul operands (f32 accumulation) -> tolerance loosened accordingly.
    assert jnp.allclose(logits, ref_logits, atol=3e-2, rtol=3e-2)
    assert jnp.allclose(loss, ref_loss, atol=3e-2, rtol=3e-2)

    print("KERNEL_OK")
</pallas_src>

<mosaic_0001>
module attributes {stable_mosaic.version = 11 : i64} {
  func.func @_head_kernel(%arg0: i32, %arg1: memref<2x128xf32, #tpu.memory_space<vmem>>, %arg2: memref<128x128xbf16, #tpu.memory_space<vmem>>, %arg3: memref<1x128xf32, #tpu.memory_space<vmem>>, %arg4: memref<128x128xbf16, #tpu.memory_space<vmem>>, %arg5: memref<1x128xf32, #tpu.memory_space<vmem>>, %arg6: memref<2x1xi32, #tpu.memory_space<vmem>>, %arg7: memref<2x128xf32, #tpu.memory_space<vmem>>, %arg8: memref<1x8x128xf32, #tpu.memory_space<vmem>>) attributes {dimension_semantics = [#tpu.dimension_semantics<parallel>], iteration_bounds = array<i64: 1>, scalar_prefetch = 0 : i64, scratch_operands = 0 : i64, tpu.core_type = #tpu.core_type<tc>, window_params = [{transform_indices = @transform_0, window_bounds = array<i64: 2, 128>}, {pipeline_mode = #tpu.pipeline_mode<synchronous>, transform_indices = @transform_1, window_bounds = array<i64: 128, 128>}, {pipeline_mode = #tpu.pipeline_mode<synchronous>, transform_indices = @transform_2, window_bounds = array<i64: 1, 128>}, {pipeline_mode = #tpu.pipeline_mode<synchronous>, transform_indices = @transform_3, window_bounds = array<i64: 128, 128>}, {pipeline_mode = #tpu.pipeline_mode<synchronous>, transform_indices = @transform_4, window_bounds = array<i64: 1, 128>}, {transform_indices = @transform_5, window_bounds = array<i64: 2, 1>}, {transform_indices = @transform_6, window_bounds = array<i64: 2, 128>}, {transform_indices = @transform_7, window_bounds = array<i64: 1, 8, 128>}]} {
    %c0 = arith.constant 0 : index
    %c0_0 = arith.constant 0 : index
    %0 = vector.load %arg1[%c0, %c0_0] : memref<2x128xf32, #tpu.memory_space<vmem>>, vector<2x128xf32>
    %1 = arith.truncf %0 : vector<2x128xf32> to vector<2x128xbf16>
    %c0_1 = arith.constant 0 : index
    %c0_2 = arith.constant 0 : index
    %2 = vector.load %arg2[%c0_1, %c0_2] : memref<128x128xbf16, #tpu.memory_space<vmem>>, vector<128x128xbf16>
    %cst = arith.constant dense<0.000000e+00> : vector<2x128xf32>
    %3 = tpu.matmul %1, %2, %cst {dimension_numbers = #tpu.dot_dimension_numbers<[1], [0], [0], [1], [0, 0, 1, 1], [], []>} : vector<2x128xbf16>, vector<128x128xbf16>, vector<2x128xf32> -> vector<2x128xf32>
    %c0_3 = arith.constant 0 : index
    %c0_4 = arith.constant 0 : index
    %4 = vector.load %arg3[%c0_3, %c0_4] : memref<1x128xf32, #tpu.memory_space<vmem>>, vector<1x128xf32>
    %5 = vector.broadcast %4 : vector<1x128xf32> to vector<2x128xf32>
    %6 = arith.addf %3, %5 : vector<2x128xf32>
    %7 = math.tanh %6 : vector<2x128xf32>
    %8 = arith.truncf %7 : vector<2x128xf32> to vector<2x128xbf16>
    %c0_5 = arith.constant 0 : index
    %c0_6 = arith.constant 0 : index
    %9 = vector.load %arg4[%c0_5, %c0_6] : memref<128x128xbf16, #tpu.memory_space<vmem>>, vector<128x128xbf16>
    %cst_7 = arith.constant dense<0.000000e+00> : vector<2x128xf32>
    %10 = tpu.matmul %8, %9, %cst_7 {dimension_numbers = #tpu.dot_dimension_numbers<[1], [0], [0], [1], [0, 0, 1, 1], [], []>} : vector<2x128xbf16>, vector<128x128xbf16>, vector<2x128xf32> -> vector<2x128xf32>
    %c0_8 = arith.constant 0 : index
    %c0_9 = arith.constant 0 : index
    %11 = vector.load %arg5[%c0_8, %c0_9] : memref<1x128xf32, #tpu.memory_space<vmem>>, vector<1x128xf32>
    %12 = vector.broadcast %11 : vector<1x128xf32> to vector<2x128xf32>
    %13 = arith.addf %10, %12 : vector<2x128xf32>
    %c0_10 = arith.constant 0 : index
    %c0_11 = arith.constant 0 : index
    %14 = vector.load %arg7[%c0_10, %c0_11] : memref<2x128xf32, #tpu.memory_space<vmem>>, vector<2x128xf32>
    tpu.vector_store %arg7[%c0_10, %c0_11], %13 {strides = array<i32>} : memref<2x128xf32, #tpu.memory_space<vmem>>, vector<2x128xf32>,
    %15 = tpu.iota {dimensions = array<i32: 1>} : vector<2x128xi32>
    %c2_i32 = arith.constant 2 : i32
    %16 = vector.broadcast %c2_i32 : i32 to vector<2x128xi32>
    %17 = arith.cmpi slt, %15, %16 : vector<2x128xi32>
    %18 = tpu.iota {dimensions = array<i32: 0>} : vector<2x1xi32>
    %c2_i32_12 = arith.constant 2 : i32
    %19 = arith.muli %arg0, %c2_i32_12 : i32
    %20 = vector.broadcast %19 : i32 to vector<2x1xi32>
    %21 = arith.addi %18, %20 : vector<2x1xi32>
    %c2_i32_13 = arith.constant 2 : i32
    %22 = vector.broadcast %c2_i32_13 : i32 to vector<2x1xi32>
    %23 = arith.cmpi slt, %21, %22 : vector<2x1xi32>
    %cst_14 = arith.constant -1.000000e+30 : f32
    %24 = vector.broadcast %cst_14 : f32 to vector<2x128xf32>
    %25 = arith.select %17, %13, %24 : vector<2x128xi1>, vector<2x128xf32>
    %cst_15 = arith.constant dense<0xFF800000> : vector<2xf32>
    %26 = vector.multi_reduction <maximumf>, %25, %cst_15 [1] : vector<2x128xf32> to vector<2xf32>
    %27 = vector.shape_cast %26 : vector<2xf32> to vector<2x1xf32>
    %28 = vector.broadcast %27 : vector<2x1xf32> to vector<2x128xf32>
    %29 = arith.subf %25, %28 : vector<2x128xf32>
    %30 = math.exp %29 : vector<2x128xf32>
    %cst_16 = arith.constant 0.000000e+00 : f32
    %31 = vector.broadcast %cst_16 : f32 to vector<2x128xf32>
    %32 = arith.select %17, %30, %31 : vector<2x128xi1>, vector<2x128xf32>
    %cst_17 = arith.constant dense<0.000000e+00> : vector<2xf32>
    %33 = vector.multi_reduction <add>, %32, %cst_17 [1] : vector<2x128xf32> to vector<2xf32>
    %34 = vector.shape_cast %33 : vector<2xf32> to vector<2x1xf32>
    %35 = math.log %34 : vector<2x1xf32>
    %36 = arith.addf %27, %35 : vector<2x1xf32>
    %c0_18 = arith.constant 0 : index
    %c0_19 = arith.constant 0 : index
    %37 = vector.load %arg6[%c0_18, %c0_19] : memref<2x1xi32, #tpu.memory_space<vmem>>, vector<2x1xi32>
    %38 = vector.broadcast %37 : vector<2x1xi32> to vector<2x128xi32>
    %39 = arith.cmpi eq, %15, %38 : vector<2x128xi32>
    %cst_20 = arith.constant 0.000000e+00 : f32
    %40 = vector.broadcast %cst_20 : f32 to vector<2x128xf32>
    %41 = arith.select %39, %13, %40 : vector<2x128xi1>, vector<2x128xf32>
    %cst_21 = arith.constant dense<0.000000e+00> : vector<2xf32>
    %42 = vector.multi_reduction <add>, %41, %cst_21 [1] : vector<2x128xf32> to vector<2xf32>
    %43 = vector.shape_cast %42 : vector<2xf32> to vector<2x1xf32>
    %44 = arith.subf %36, %43 : vector<2x1xf32>
    %cst_22 = arith.constant 0.000000e+00 : f32
    %45 = vector.broadcast %cst_22 : f32 to vector<2x1xf32>
    %46 = arith.select %23, %44, %45 : vector<2x1xi1>, vector<2x1xf32>
    %47 = vector.shape_cast %46 : vector<2x1xf32> to vector<1x2x1xf32>
    %cst_23 = arith.constant dense<0.000000e+00> : vector<1xf32>
    %48 = vector.multi_reduction <add>, %47, %cst_23 [1, 2] : vector<1x2x1xf32> to vector<1xf32>
    %49 = vector.shape_cast %48 : vector<1xf32> to vector<1x1x1xf32>
    %50 = vector.extract %49[0, 0, 0] : f32 from vector<1x1x1xf32>
    %51 = vector.broadcast %50 : f32 to vector<1x8x128xf32>
    %c0_24 = arith.constant 0 : index
    %c0_25 = arith.constant 0 : index
    %c0_26 = arith.constant 0 : index
    %52 = vector.load %arg8[%c0_24, %c0_25, %c0_26] : memref<1x8x128xf32, #tpu.memory_space<vmem>>, vector<1x8x128xf32>
    tpu.vector_store %arg8[%c0_24, %c0_25, %c0_26], %51 {strides = array<i32>} : memref<1x8x128xf32, #tpu.memory_space<vmem>>, vector<1x8x128xf32>,
    return
  }
  func.func @transform_0(%arg0: i32) -> (i32, i32) {
    %c0_i32 = arith.constant 0 : i32
    %c0_i32_0 = arith.constant 0 : i32
    return %arg0, %c0_i32 : i32, i32
  }
  func.func @transform_1(%arg0: i32) -> (i32, i32) {
    %c0_i32 = arith.constant 0 : i32
    %c0_i32_0 = arith.constant 0 : i32
    %c0_i32_1 = arith.constant 0 : i32
    return %c0_i32, %c0_i32_0 : i32, i32
  }
  func.func @transform_2(%arg0: i32) -> (i32, i32) {
    %c0_i32 = arith.constant 0 : i32
    %c0_i32_0 = arith.constant 0 : i32
    %c0_i32_1 = arith.constant 0 : i32
    return %c0_i32, %c0_i32_0 : i32, i32
  }
  func.func @transform_3(%arg0: i32) -> (i32, i32) {
    %c0_i32 = arith.constant 0 : i32
    %c0_i32_0 = arith.constant 0 : i32
    %c0_i32_1 = arith.constant 0 : i32
    return %c0_i32, %c0_i32_0 : i32, i32
  }
  func.func @transform_4(%arg0: i32) -> (i32, i32) {
    %c0_i32 = arith.constant 0 : i32
    %c0_i32_0 = arith.constant 0 : i32
    %c0_i32_1 = arith.constant 0 : i32
    return %c0_i32, %c0_i32_0 : i32, i32
  }
  func.func @transform_5(%arg0: i32) -> (i32, i32) {
    %c0_i32 = arith.constant 0 : i32
    %c0_i32_0 = arith.constant 0 : i32
    return %arg0, %c0_i32 : i32, i32
  }
  func.func @transform_6(%arg0: i32) -> (i32, i32) {
    %c0_i32 = arith.constant 0 : i32
    %c0_i32_0 = arith.constant 0 : i32
    return %arg0, %c0_i32 : i32, i32
  }
  func.func @transform_7(%arg0: i32) -> (i32, i32, i32) {
    %c0_i32 = arith.constant 0 : i32
    %c0_i32_0 = arith.constant 0 : i32
    %c0_i32_1 = arith.constant 0 : i32
    return %arg0, %c0_i32, %c0_i32_0 : i32, i32, i32
  }
}

</mosaic_0001>

<bundles_post_ra>
// kernel: classification_head.1
= control target key start
LH: loop header
LB: loop body
LE: loop exit
PB: predicated region body
PF: predicated region fallthrough
CT: control target
= control target key end

     0   :  { %13 = vsyncpa [#allocation3], 0  ;;  %s602_s0 = inlined_call_operand.vmem [shape: f32[2,1024], index: 0, kind: input, shape index: {}]   ;;  %s603_s1 = inlined_call_operand.hbm [shape: bf16[128,128], index: 1, kind: input, shape index: {}]   ;;  %s604_s2 = inlined_call_operand.vmem [shape: f32[1,128], index: 2, kind: input, shape index: {}]   ;;  %s605_s3 = inlined_call_operand.hbm [shape: bf16[128,128], index: 3, kind: input, shape index: {}]   ;;  %s606_s4 = inlined_call_operand.vmem [shape: f32[1,128], index: 4, kind: input, shape index: {}]   ;;  %s607_s5 = inlined_call_operand.vmem [shape: s32[2,1], index: 5, kind: input, shape index: {}]   ;;  %s608_s6 = inlined_call_operand.hbm [shape: f32[2,128], index: 6, kind: output, shape index: {0}]   ;;  %s609_s7 = inlined_call_operand.vmem [shape: f32[1,8,128], index: 7, kind: output, shape index: {1}]  }
   0x1   :  { %14 = vsyncpa [#allocation6], 0 }
   0x2   :  { %15 = vsyncpa [#allocation4], 0  ;;  %s525_s24 = smov [#allocation2]  }
   0x3   :  { %s23_s25 = sshll.u32 %s525_s24, 4  ;;  %s24_s25 = int_to_ptr.vmem [resolvable:$true] %s23_s25 }
   0x4   :  { %s467_s26 = scalar_lea.vmem %s24_s25, 1024  ;;  %p472_p1 = scmp.lt.s32.totalorder %s24_s25, %s24_s25 }
   0x5   :  { %p468_p0 = scmp.ne.s32.totalorder %s24_s25, %s467_s26  ;;  %p473_p2 = scmp.lt.s32.totalorder %s467_s26, %s467_s26 }
   0x7   :  { %p474_p3 = por %p473_p2, %p472_p1 }
   0x9   :  { %p475_p4 = pnand %p474_p3, %p468_p0 }
   0xb   :  { %478 = shalt.err (!%p475_p4)
}
   0xc   :  { %s526_s27 = smov 64   ;;  %s527_s28 = smov 4  }
   0xd   :  { %29 = dma.hbm_to_vmem [thread:$0]  %s603_s1, 1024, %s24_s25, [#allocation3], %s526_s27, %s526_s27, %s527_s28  }
   0xe   :  { %s528_s8 = smov [#allocation5]  }
   0xf   :  { %s37_s9 = sshll.u32 %s528_s8, 4  ;;  %s38_s9 = int_to_ptr.vmem [resolvable:$true] %s37_s9 }
  0x10   :  { %s487_s10 = scalar_lea.vmem %s38_s9, 1024  ;;  %p492_p6 = scmp.lt.s32.totalorder %s38_s9, %s38_s9 }
  0x11   :  { %p488_p5 = scmp.ne.s32.totalorder %s38_s9, %s487_s10  ;;  %p493_p7 = scmp.lt.s32.totalorder %s487_s10, %s487_s10 }
  0x13   :  { %p494_p8 = por %p493_p7, %p492_p6 }
  0x15   :  { %p495_p9 = pnand %p494_p8, %p488_p5 }
  0x17   :  { %498 = shalt.err (!%p495_p9)
}
  0x18   :  { %43 = dma.hbm_to_vmem [thread:$0]  %s605_s3, 1024, %s38_s9, [#allocation6], %s526_s27, %s526_s27, %s527_s28  }
  0x19   :  { %519 = dma.done.wait [#allocation3], 1024  }
  0x1a   :  { %520 = vsyncadd [#allocation3], 4294966272 }
  0x1b   :  { %521 = dma.done.wait [#allocation6], 1024  }
  0x1c   :  { %522 = vsyncadd [#allocation6], 4294966272  ;;  %v529_v0 = vmov 0.0   ;;  %vm530_vm0 = vmmov 0   ;;  %v437_v1 = vld [vmem:[#allocation2 + $0x38] sm:$0xff]   ;;  %v438_v2 = vld [vmem:[#allocation2 + $0x30] sm:$0xff]   ;;  %v282_v28 = vlaneseq }
  0x1d   :  { %386 = vmatprep.subr.bf16.mxu0 %v529_v0  ;;  %402 = vmatprep.mubr.msk.bf16.mxu0 %vm530_vm0, %v529_v0  ;;  %v439_v3 = vld [vmem:[#allocation2 + $0x28] sm:$0xff]   ;;  %v445_v4 = vld [vmem:[#allocation5 + $0x38] sm:$0xff]   ;;  %v440_v5 = vld [vmem:[#allocation2 + $0x20] sm:$0xff]   ;;  %v531_v27 = vmov 0   ;;  %vm292_vm2 = vcmask 1041408   ;;  %vm317_vm5 = vcmask 1024  }
  0x1e   :  { %406 = vmatprep.subr.bf16.mxu1 %v529_v0  ;;  %422 = vmatprep.mubr.msk.bf16.mxu1 %vm530_vm0, %v529_v0  ;;  %v446_v6 = vld [vmem:[#allocation5 + $0x30] sm:$0xff]   ;;  %v441_v7 = vld [vmem:[#allocation2 + $0x18] sm:$0xff]   ;;  %v447_v8 = vld [vmem:[#allocation5 + $0x28] sm:$0xff]   ;;  %v283_v29 = vand.u32 127, %v282_v28  ;;  %v286_v50 = vshrl.u32 %v282_v28, 7 }
  0x1f   :  { %387 = vmatpush3.bf16.msra.mxu0 %v437_v1  ;;  %407 = vmatpush3.bf16.msra.mxu1 %v445_v4  ;;  %v442_v9 = vld [vmem:[#allocation2 + $0x10] sm:$0xff]   ;;  %v443_v10 = vld [vmem:[#allocation2 + $0x8] sm:$0xff]   ;;  %v444_v11 = vld [vmem:[#allocation2] sm:$0xff]  }
  0x20   :  { %388 = vmatprep.subr.bf16.mxu0 %v529_v0  ;;  %408 = vmatprep.subr.bf16.mxu1 %v529_v0  ;;  %v55_v12 = vld [vmem:[%s602_s0] sm:$0x3]  ;;  %v449_v15 = vld [vmem:[#allocation5 + $0x18] sm:$0xff]   ;;  %v450_v16 = vld [vmem:[#allocation5 + $0x10] sm:$0xff]   ;;  %vm284_vm1 = vcmp.lt.s32.totalorder %v283_v29, 2  ;;  %vm290_vm4 = vcmp.lt.s32.totalorder %v286_v50, 2 }
  0x21   :  { %v56_v13 = vpack.c.bf16 %v55_v12, %v55_v12  ;;  %v448_v14 = vld [vmem:[#allocation5 + $0x20] sm:$0xff]   ;;  %v451_v17 = vld [vmem:[#allocation5 + $0x8] sm:$0xff]   ;;  %436 = vset.pattern.permute.xlu0 %v531_v27 }
  0x22   :  { %v452_v18 = vld [vmem:[#allocation5] sm:$0xff]  }
  0x23   :  { %389 = vmatpush3.bf16.msra.mxu0 %v438_v2  ;;  %409 = vmatpush3.bf16.msra.mxu1 %v446_v6  ;;  %v350_v19 = vld [vmem:[%s604_s2] ss:$0 sm:$0xff] }
  0x24   :  { %390 = vmatprep.subr.bf16.mxu0 %v529_v0  ;;  %410 = vmatprep.subr.bf16.mxu1 %v529_v0  ;;  %v359_v30 = vld [vmem:[%s606_s4] ss:$0 sm:$0xff]  ;;  %s532_s4 = smov [#allocation7]  }
  0x25   :  { %v306_v38 = vld [vmem:[%s607_s5] sm:$0x3]  ;;  %s336_s5 = sshll.u32 %s532_s4, 4  ;;  %s337_s5 = int_to_ptr.vmem [resolvable:$true] %s336_s5 }
  0x26   :  { %s499_s17 = scalar_lea.vmem %s337_s5, 32  ;;  %p504_p11 = scmp.lt.s32.totalorder %s337_s5, %s337_s5 }
  0x27   :  { %391 = vmatpush3.bf16.msra.mxu0 %v439_v3  ;;  %411 = vmatpush3.bf16.msra.mxu1 %v447_v8  ;;  %p500_p10 = scmp.ne.s32.totalorder %s337_s5, %s499_s17  ;;  %p505_p12 = scmp.lt.s32.totalorder %s499_s17, %s499_s17 }
  0x28   :  { %392 = vmatprep.subr.bf16.mxu0 %v529_v0  ;;  %412 = vmatprep.subr.bf16.mxu1 %v529_v0 }
  0x29   :  { %p506_p13 = por %p505_p12, %p504_p11 }
  0x2b   :  { %393 = vmatpush3.bf16.msra.mxu0 %v440_v5  ;;  %413 = vmatpush3.bf16.msra.mxu1 %v448_v14  ;;  %p507_p0 = pnand %p506_p13, %p500_p10 }
  0x2c   :  { %394 = vmatprep.subr.bf16.mxu0 %v529_v0  ;;  %414 = vmatprep.subr.bf16.mxu1 %v529_v0 }
  0x2f   :  { %395 = vmatpush3.bf16.msra.mxu0 %v441_v7  ;;  %415 = vmatpush3.bf16.msra.mxu1 %v449_v15 }
  0x30   :  { %396 = vmatprep.subr.bf16.mxu0 %v529_v0  ;;  %416 = vmatprep.subr.bf16.mxu1 %v529_v0 }
  0x33   :  { %397 = vmatpush3.bf16.msra.mxu0 %v442_v9  ;;  %417 = vmatpush3.bf16.msra.mxu1 %v450_v16 }
  0x34   :  { %398 = vmatprep.subr.bf16.mxu0 %v529_v0  ;;  %418 = vmatprep.subr.bf16.mxu1 %v529_v0 }
  0x37   :  { %399 = vmatpush3.bf16.msra.mxu0 %v443_v10  ;;  %419 = vmatpush3.bf16.msra.mxu1 %v451_v17 }
  0x38   :  { %400 = vmatprep.subr.bf16.mxu0 %v529_v0  ;;  %420 = vmatprep.subr.bf16.mxu1 %v529_v0 }
  0x3b   :  { %401 = vmatpush3.bf16.msra.mxu0 %v444_v11  ;;  %421 = vmatpush3.bf16.msra.mxu1 %v452_v18 }
  0x3e   :  { %403 = vmatmul.mubr.bf16.vlgmr.msra.gmra.mxu0 %v56_v13 }
  0xfe   :  { %v162_v20 = vpop.f32.mrf.mxu0 }
  0xff   :  { %v163_v21 = vadd.f32 %v350_v19, %v162_v20 }
 0x100   :  { %v404_v22 = vpop.f32.mrf.mxu0 }
 0x101   :  { %453 = vtanh.f32 %v163_v21 }
 0x102   :  { %v165_v23 = vpop.f32.mrf.mxu0 }
 0x104   :  { %v405_v24 = vpop.f32.mrf.mxu0 }
 0x10e   :  { %v454_v25 = vpop.eup %453 }
 0x10f   :  { %v169_v26 = vpack.c.bf16 %v454_v25, %v454_v25 }
 0x111   :  { %423 = vmatmul.mubr.bf16.vlgmr.msra.gmra.mxu1 %v169_v26 }
 0x1d1   :  { %v275_v31 = vpop.f32.mrf.mxu1 }
 0x1d2   :  { %v276_v32 = vadd.f32 %v359_v30, %v275_v31 }
 0x1d3   :  { %v424_v33 = vpop.f32.mrf.mxu1 }
 0x1d4   :  { %281 = vst [vmem:[#allocation7] sm:$0x3] %v276_v32  ;;  %v291_v34 = vsel %vm284_vm1, %v276_v32, -1e+30 }
 0x1d5   :  { %v278_v35 = vpop.f32.mrf.mxu1  ;;  %v293_v36 = vsel %vm292_vm2, %v291_v34, -inf }
 0x1d6   :  { %294 = vmax.xlane.f32.xlu0 %v293_v36 }
 0x1d7   :  { %v425_v37 = vpop.f32.mrf.mxu1 }
 0x1ec   :  { %308 = vperm.xlu0 %436, %v306_v38  }
 0x25f   :  { %v295_v39 = vpop.xlane.xlu0 %294 }
 0x260   :  { %v296_v40 = vsub.f32 %v291_v34, %v295_v39 }
 0x262   :  { %v297_v41 = vmul.f32 1.442695, %v296_v40 }
 0x264   :  { %455 = vpow2.f32 %v297_v41 }
 0x267   :  { %v309_v42 = vpop.permute.xlu0 %308 }
 0x268   :  { %vm310_vm3 = vcmp.eq.s32.totalorder %v283_v29, %v309_v42 }
 0x269   :  { %v311_v46 = vsel %vm310_vm3, %v276_v32, 0.0 }
 0x26a   :  { %v312_v47 = vsel %vm292_vm2, %v311_v46, 0.0 }
 0x271   :  { %v456_v43 = vpop.eup %455 }
 0x272   :  { %v299_v44 = vsel %vm284_vm1, %v456_v43, 0.0 }
 0x273   :  { %v300_v45 = vsel %vm292_vm2, %v299_v44, 0.0 }
 0x274   :  { %301 = vadd.xlane.f32.xlu1 %v300_v45 }
 0x278   :  { %313 = vadd.xlane.f32.xlu1 %v312_v47 }
 0x2fd   :  { %v302_v48 = vpop.xlane.xlu1 %301 }
 0x2fe   :  { %457 = vlog2.f32 %v302_v48 }
 0x301   :  { %v314_v53 = vpop.xlane.xlu1 %313 }
 0x30b   :  { %v458_v49 = vpop.eup %457 }
 0x30c   :  { %v304_v51 = vmul.f32 0.6931472, %v458_v49 }
 0x30e   :  { %v305_v52 = vadd.f32 %v304_v51, %v295_v39 }
 0x310   :  { %v315_v54 = vsub.f32 %v305_v52, %v314_v53 }
 0x312   :  { %v316_v55 = vsel %vm290_vm4, %v315_v54, 0.0 }
 0x313   :  { %v318_v56 = vsel %vm317_vm5, %v316_v55, 0.0 }
 0x314   :  { %319 = vadd.xlane.f32.xlu1 %v318_v56 }
 0x315   :  { %510 = shalt.err (!%p507_p0)
}
 0x316   :  { %339 = dma.vmem_to_hbm [thread:$0]  %s337_s5, 32, %s608_s6, [#allocation4]  }
 0x39d   :  { %v320_v57 = vpop.xlane.xlu1 %319 }
 0x39e   :  { %v321_v58 = vrot.slane %v320_v57, 4 }
 0x3a0   :  { %v322_v59 = vadd.f32 %v321_v58, %v320_v57 }
 0x3a2   :  { %v323_v60 = vrot.slane %v322_v59, 2 }
 0x3a4   :  { %v324_v61 = vadd.f32 %v323_v60, %v322_v59 }
 0x3a6   :  { %v325_v62 = vrot.slane %v324_v61, 1 }
 0x3a8   :  { %v326_v63 = vadd.f32 %v325_v62, %v324_v61 }
 0x3aa   :  { %426 = vpush %v326_v63 }
 0x3db   :  { %s427_s20 = spop %426 }
 0x3dc   :  { %v328_v0 = vstv %s427_s20 }
 0x3dd   :  { %329 = vst [vmem:[%s609_s7] sm:$0xff] %v328_v0 }
 0x3de   :  { %523 = dma.done.wait [#allocation4], 32  }
 0x3df   :  { %524 = vsyncadd [#allocation4], 4294967264 }
 0x3e0   :  { %347 = vsyncpa [#allocation3], 1 }
 0x3e1   :  { %348 = vsyncpa [#allocation6], 1 }
 0x3e2   :  { %349 = vsyncpa [#allocation4], 1 }

</bundles_post_ra>
